<compile_context>
chip_gen: v7x
topology: tpu7x:2x2x1
jax: 0.10.0
libtpu: 0.0.40
codegen_flags: <defaults>
</compile_context>

<pallas_src>
import jax
import jax.numpy as jnp
from jax.experimental import pallas as pl
from jax.experimental.pallas import tpu as pltpu

T_REDUCE = 1.0
TIMESTEP = 2.5

T1 = TIMESTEP              # 2.5
T2 = TIMESTEP + 1.0        # 3.5
T3 = TIMESTEP - 1.0        # 1.5

MIN_1 = 0.0
MAX_1 = T_REDUCE / T1      # 0.4
CAP2 = T_REDUCE / T2       # 1/3.5
CAP3 = T_REDUCE / T3       # 1/1.5

_TARGET_ELEMS = 256 * 1024  # fp32 elements per *input* tile (~1 MiB); output tile is 3x


def _quant_kernel(x_ref, out_ref):
    x = x_ref[...]                                   # (n_tile, r_tile, L)

    # branch 1 (q level = timestep)
    x1 = jnp.clip(jnp.floor(x * T1) / T1, MIN_1, MAX_1)

    # branch 2 (q level = timestep + 1); saturated values remapped to MAX_1
    x2 = jnp.clip(jnp.floor(x * T2) / T2, MIN_1, CAP2)
    x2 = jnp.where(x2 == CAP2, MAX_1, x2)

    # branch 3 (q level = timestep - 1); saturated values remapped to MAX_1
    x3 = jnp.clip(jnp.floor(x * T3) / T3, MIN_1, CAP3)
    x3 = jnp.where(x3 == CAP3, MAX_1, x3)

    # fused concat: out layout is (n, branch, rows, lanes); order (x3, x1, x2)
    out_ref[:, 0] = x3
    out_ref[:, 1] = x1
    out_ref[:, 2] = x2


def _pick_tiles(n, chw):
    """Factor the per-image slab (chw elems) into (rows, lanes) tiles.

    Returns (n_tile, lanes, rows, row_tile).  lanes is a multiple of 128 when
    possible; row_tile is a multiple of 8 or equal to the full row extent.
    """
    lanes = None
    for cand in (512, 256, 128):
        if chw % cand == 0:
            lanes = cand
            break
    if lanes is None:
        # TODO(synk): C*H*W not a multiple of 128 -> single lane-ragged row per
        # image (correct but sub-optimal masked stores).
        return 1, chw, 1, 1

    rows = chw // lanes
    max_rows = max(8, _TARGET_ELEMS // lanes)
    if rows <= max_rows:
        row_tile = rows                               # full extent (always legal)
        n_tile = max(1, min(n, _TARGET_ELEMS // (rows * lanes)))
    else:
        row_tile = max_rows - (max_rows % 8)          # multiple of 8
        n_tile = 1
    return n_tile, lanes, rows, row_tile


def clamp_q_new(x):
    """x: (N, C, H, W) float32 -> (N, 3C, H, W) float32, order (x3, x1, x2)."""
    N, C, H, W = x.shape
    chw = C * H * W
    n_tile, lanes, rows, row_tile = _pick_tiles(N, chw)

    x_view = x.reshape(N, rows, lanes)                # free reshape (contiguous)
    grid = (pl.cdiv(N, n_tile), pl.cdiv(rows, row_tile))

    out = pl.pallas_call(
        _quant_kernel,
        out_shape=jax.ShapeDtypeStruct((N, 3, rows, lanes), x.dtype),
        grid=grid,
        in_specs=[
            pl.BlockSpec((n_tile, row_tile, lanes), lambda i, r: (i, r, 0)),
        ],
        out_specs=pl.BlockSpec(
            (n_tile, 3, row_tile, lanes), lambda i, r: (i, 0, r, 0)
        ),
        compiler_params=pltpu.CompilerParams(
            dimension_semantics=("parallel", "parallel"),
        ),
    )(x_view)

    # (N, 3, C*H*W) -> (N, 3C, H, W): free reshape, matches torch.cat((x3,x1,x2),1)
    return out.reshape(N, 3 * C, H, W)


def _reference(x):
    x1 = jnp.clip(jnp.floor(x * T1) / T1, MIN_1, MAX_1)
    x2 = jnp.clip(jnp.floor(x * T2) / T2, MIN_1, CAP2)
    x2 = jnp.where(x2 == CAP2, MAX_1, x2)
    x3 = jnp.clip(jnp.floor(x * T3) / T3, MIN_1, CAP3)
    x3 = jnp.where(x3 == CAP3, MAX_1, x3)
    return jnp.concatenate([x3, x1, x2], axis=1)


if __name__ == "__main__":
    key = jax.random.PRNGKey(0)
    # small NCHW input consistent with the module's 4-D expectation
    x = jax.random.normal(key, (2, 4, 16, 16), dtype=jnp.float32)

    out = clamp_q_new(x)
    out = jax.block_until_ready(out)

    ref = _reference(x)
    assert out.shape == (2, 12, 16, 16), out.shape
    assert jnp.allclose(out, ref, atol=1e-6), "mismatch vs reference"

    print("KERNEL_OK")
</pallas_src>

<mosaic_0001>
module attributes {stable_mosaic.version = 11 : i64} {
  func.func @_quant_kernel(%arg0: i32, %arg1: i32, %arg2: memref<2x2x512xf32, #tpu.memory_space<vmem>>, %arg3: memref<2x3x2x512xf32, #tpu.memory_space<vmem>>) attributes {dimension_semantics = [#tpu.dimension_semantics<parallel>, #tpu.dimension_semantics<parallel>], iteration_bounds = array<i64: 1, 1>, scalar_prefetch = 0 : i64, scratch_operands = 0 : i64, tpu.core_type = #tpu.core_type<tc>, window_params = [{transform_indices = @transform_0, window_bounds = array<i64: 2, 2, 512>}, {transform_indices = @transform_1, window_bounds = array<i64: 2, 3, 2, 512>}]} {
    %c0 = arith.constant 0 : index
    %c0_0 = arith.constant 0 : index
    %c0_1 = arith.constant 0 : index
    %0 = vector.load %arg2[%c0, %c0_0, %c0_1] : memref<2x2x512xf32, #tpu.memory_space<vmem>>, vector<2x2x512xf32>
    %cst = arith.constant 2.500000e+00 : f32
    %1 = vector.broadcast %cst : f32 to vector<2x2x512xf32>
    %2 = arith.mulf %0, %1 : vector<2x2x512xf32>
    %3 = math.floor %2 : vector<2x2x512xf32>
    %cst_2 = arith.constant 2.500000e+00 : f32
    %4 = vector.broadcast %cst_2 : f32 to vector<2x2x512xf32>
    %5 = arith.divf %3, %4 : vector<2x2x512xf32>
    %cst_3 = arith.constant 0.000000e+00 : f32
    %cst_4 = arith.constant 4.000000e-01 : f32
    %6 = vector.broadcast %cst_3 : f32 to vector<2x2x512xf32>
    %7 = arith.maximumf %6, %5 : vector<2x2x512xf32>
    %8 = vector.broadcast %cst_4 : f32 to vector<2x2x512xf32>
    %9 = arith.minimumf %8, %7 : vector<2x2x512xf32>
    %cst_5 = arith.constant 3.500000e+00 : f32
    %10 = vector.broadcast %cst_5 : f32 to vector<2x2x512xf32>
    %11 = arith.mulf %0, %10 : vector<2x2x512xf32>
    %12 = math.floor %11 : vector<2x2x512xf32>
    %cst_6 = arith.constant 3.500000e+00 : f32
    %13 = vector.broadcast %cst_6 : f32 to vector<2x2x512xf32>
    %14 = arith.divf %12, %13 : vector<2x2x512xf32>
    %cst_7 = arith.constant 0.000000e+00 : f32
    %cst_8 = arith.constant 0.285714298 : f32
    %15 = vector.broadcast %cst_7 : f32 to vector<2x2x512xf32>
    %16 = arith.maximumf %15, %14 : vector<2x2x512xf32>
    %17 = vector.broadcast %cst_8 : f32 to vector<2x2x512xf32>
    %18 = arith.minimumf %17, %16 : vector<2x2x512xf32>
    %cst_9 = arith.constant 0.285714298 : f32
    %19 = vector.broadcast %cst_9 : f32 to vector<2x2x512xf32>
    %20 = arith.cmpf oeq, %18, %19 : vector<2x2x512xf32>
    %cst_10 = arith.constant 4.000000e-01 : f32
    %21 = vector.broadcast %cst_10 : f32 to vector<2x2x512xf32>
    %22 = arith.select %20, %21, %18 : vector<2x2x512xi1>, vector<2x2x512xf32>
    %cst_11 = arith.constant 1.500000e+00 : f32
    %23 = vector.broadcast %cst_11 : f32 to vector<2x2x512xf32>
    %24 = arith.mulf %0, %23 : vector<2x2x512xf32>
    %25 = math.floor %24 : vector<2x2x512xf32>
    %cst_12 = arith.constant 1.500000e+00 : f32
    %26 = vector.broadcast %cst_12 : f32 to vector<2x2x512xf32>
    %27 = arith.divf %25, %26 : vector<2x2x512xf32>
    %cst_13 = arith.constant 0.000000e+00 : f32
    %cst_14 = arith.constant 0.666666686 : f32
    %28 = vector.broadcast %cst_13 : f32 to vector<2x2x512xf32>
    %29 = arith.maximumf %28, %27 : vector<2x2x512xf32>
    %30 = vector.broadcast %cst_14 : f32 to vector<2x2x512xf32>
    %31 = arith.minimumf %30, %29 : vector<2x2x512xf32>
    %cst_15 = arith.constant 0.666666686 : f32
    %32 = vector.broadcast %cst_15 : f32 to vector<2x2x512xf32>
    %33 = arith.cmpf oeq, %31, %32 : vector<2x2x512xf32>
    %cst_16 = arith.constant 4.000000e-01 : f32
    %34 = vector.broadcast %cst_16 : f32 to vector<2x2x512xf32>
    %35 = arith.select %33, %34, %31 : vector<2x2x512xi1>, vector<2x2x512xf32>
    %c0_17 = arith.constant 0 : index
    %c0_18 = arith.constant 0 : index
    %c0_19 = arith.constant 0 : index
    %c0_20 = arith.constant 0 : index
    %36 = vector.load %arg3[%c0_17, %c0_18, %c0_19, %c0_20] : memref<2x3x2x512xf32, #tpu.memory_space<vmem>>, vector<2x1x2x512xf32>
    %37 = vector.shape_cast %36 : vector<2x1x2x512xf32> to vector<2x2x512xf32>
    %38 = vector.shape_cast %35 : vector<2x2x512xf32> to vector<2x1x2x512xf32>
    tpu.vector_store %arg3[%c0_17, %c0_18, %c0_19, %c0_20], %38 {strides = array<i32>} : memref<2x3x2x512xf32, #tpu.memory_space<vmem>>, vector<2x1x2x512xf32>,
    %c0_21 = arith.constant 0 : index
    %c1 = arith.constant 1 : index
    %c0_22 = arith.constant 0 : index
    %c0_23 = arith.constant 0 : index
    %39 = vector.load %arg3[%c0_21, %c1, %c0_22, %c0_23] : memref<2x3x2x512xf32, #tpu.memory_space<vmem>>, vector<2x1x2x512xf32>
    %40 = vector.shape_cast %39 : vector<2x1x2x512xf32> to vector<2x2x512xf32>
    %41 = vector.shape_cast %9 : vector<2x2x512xf32> to vector<2x1x2x512xf32>
    tpu.vector_store %arg3[%c0_21, %c1, %c0_22, %c0_23], %41 {strides = array<i32>} : memref<2x3x2x512xf32, #tpu.memory_space<vmem>>, vector<2x1x2x512xf32>,
    %c0_24 = arith.constant 0 : index
    %c2 = arith.constant 2 : index
    %c0_25 = arith.constant 0 : index
    %c0_26 = arith.constant 0 : index
    %42 = vector.load %arg3[%c0_24, %c2, %c0_25, %c0_26] : memref<2x3x2x512xf32, #tpu.memory_space<vmem>>, vector<2x1x2x512xf32>
    %43 = vector.shape_cast %42 : vector<2x1x2x512xf32> to vector<2x2x512xf32>
    %44 = vector.shape_cast %22 : vector<2x2x512xf32> to vector<2x1x2x512xf32>
    tpu.vector_store %arg3[%c0_24, %c2, %c0_25, %c0_26], %44 {strides = array<i32>} : memref<2x3x2x512xf32, #tpu.memory_space<vmem>>, vector<2x1x2x512xf32>,
    return
  }
  func.func @transform_0(%arg0: i32, %arg1: i32) -> (i32, i32, i32) {
    %c0_i32 = arith.constant 0 : i32
    %c0_i32_0 = arith.constant 0 : i32
    return %arg0, %arg1, %c0_i32 : i32, i32, i32
  }
  func.func @transform_1(%arg0: i32, %arg1: i32) -> (i32, i32, i32, i32) {
    %c0_i32 = arith.constant 0 : i32
    %c0_i32_0 = arith.constant 0 : i32
    %c0_i32_1 = arith.constant 0 : i32
    return %arg0, %c0_i32, %arg1, %c0_i32_0 : i32, i32, i32, i32
  }
}

</mosaic_0001>

<bundles_post_ra>
// kernel: tpu_custom_call.1
= control target key start
LH: loop header
LB: loop body
LE: loop exit
PB: predicated region body
PF: predicated region fallthrough
CT: control target
= control target key end

     0   :  { %6 = vsyncpa [#allocation3], 0  ;;  %s187_s0 = inlined_call_operand.hbm [shape: f32[2,2,512], index: 0, kind: input, shape index: {}]   ;;  %s188_s1 = inlined_call_operand.hbm [shape: f32[2,3,2,512], index: 1, kind: output, shape index: {}]  }
   0x1   :  { %7 = vsyncpa [#allocation4], 0  ;;  %s143_s6 = smov [#allocation2]   ;;  %s95_s10 = scalar_lea.hbm %s187_s0, 256 }
   0x2   :  { %s13_s7 = sshll.u32 %s143_s6, 4  ;;  %p96_p0 = scmp.ne.s32.totalorder %s187_s0, %s95_s10  ;;  %s14_s7 = int_to_ptr.vmem [resolvable:$true] %s13_s7 }
   0x3   :  { %p99_p1 = scmp.lt.u32.totalorder %s95_s10, %s187_s0 }
   0x5   :  { %p101_p2 = pnand %p99_p1, %p96_p0 }
   0x7   :  { %104 = shalt.err (!%p101_p2)
}
   0x8   :  { %s105_s15 = scalar_lea.vmem %s14_s7, 256  ;;  %p110_p4 = scmp.lt.s32.totalorder %s14_s7, %s14_s7 }
   0x9   :  { %p106_p3 = scmp.ne.s32.totalorder %s14_s7, %s105_s15  ;;  %p111_p5 = scmp.lt.s32.totalorder %s105_s15, %s105_s15 }
   0xb   :  { %p112_p6 = por %p111_p5, %p110_p4 }
   0xd   :  { %p113_p7 = pnand %p112_p6, %p106_p3 }
   0xf   :  { %116 = shalt.err (!%p113_p7)
}
  0x10   :  { %s144_s16 = smov 128   ;;  %s145_s17 = smov 8  }
  0x11   :  { %19 = dma.hbm_to_vmem [thread:$0]  %s187_s0, 256, %s14_s7, [#allocation3], %s144_s16, %s144_s16, %s145_s17  }
  0x12   :  { %139 = dma.done.wait [#allocation3], 256  }
  0x13   :  { %140 = vsyncadd [#allocation3], 4294967040  ;;  %v23_v0 = vld [vmem:[#allocation2] sm:$0xff]  ;;  %v24_v1 = vld [vmem:[#allocation2 + $0x8] sm:$0xff]  ;;  %s146_s0 = smov [#allocation5]  }
  0x14   :  { %v51_v2 = vmul.f32 1.5, %v23_v0  ;;  %v52_v3 = vmul.f32 1.5, %v24_v1  ;;  %v25_v4 = vmul.f32 2.5, %v23_v0  ;;  %v26_v5 = vmul.f32 2.5, %v24_v1  ;;  %s79_s20 = sshll.u32 %s146_s0, 4  ;;  %s80_s20 = int_to_ptr.vmem [resolvable:$true] %s79_s20 }
  0x15   :  { %v36_v6 = vmul.f32 3.5, %v23_v0  ;;  %v37_v7 = vmul.f32 3.5, %v24_v1  ;;  %s117_s21 = scalar_lea.vmem %s80_s20, 768  ;;  %p122_p9 = scmp.lt.s32.totalorder %s80_s20, %s80_s20 }
  0x16   :  { %v53_v8 = vfloor.f32 %v51_v2  ;;  %v54_v9 = vfloor.f32 %v52_v3  ;;  %v27_v10 = vfloor.f32 %v25_v4  ;;  %v28_v11 = vfloor.f32 %v26_v5  ;;  %p118_p8 = scmp.ne.s32.totalorder %s80_s20, %s117_s21  ;;  %p123_p10 = scmp.lt.s32.totalorder %s117_s21, %s117_s21 }
  0x17   :  { %v38_v12 = vfloor.f32 %v36_v6  ;;  %v39_v13 = vfloor.f32 %v37_v7 }
  0x18   :  { %v56_v14 = vmul.f32 0.6666667, %v53_v8  ;;  %v57_v15 = vmul.f32 0.6666667, %v54_v9  ;;  %v30_v16 = vmul.f32 0.4, %v27_v10  ;;  %p124_p11 = por %p123_p10, %p122_p9 }
  0x19   :  { %v31_v17 = vmul.f32 0.4, %v28_v11  ;;  %v41_v18 = vmul.f32 0.2857143, %v38_v12  ;;  %v42_v19 = vmul.f32 0.2857143, %v39_v13 }
  0x1a   :  { %v58_v20 = vmax.f32 %v56_v14, 0.0  ;;  %v59_v21 = vmax.f32 %v57_v15, 0.0  ;;  %v32_v22 = vmax.f32 %v30_v16, 0.0  ;;  %p125_p12 = pnand %p124_p11, %p118_p8 }
  0x1b   :  { %v33_v23 = vmax.f32 %v31_v17, 0.0  ;;  %v43_v24 = vmax.f32 %v41_v18, 0.0  ;;  %v44_v25 = vmax.f32 %v42_v19, 0.0 }
  0x1c   :  { %v60_v26 = vmin.f32 %v58_v20, 0.6666667  ;;  %v61_v27 = vmin.f32 %v59_v21, 0.6666667  ;;  %v34_v28 = vmin.f32 %v32_v22, 0.4 }
  0x1d   :  { %v35_v29 = vmin.f32 %v33_v23, 0.4  ;;  %v45_v30 = vmin.f32 %v43_v24, 0.2857143  ;;  %v46_v31 = vmin.f32 %v44_v25, 0.2857143 }
  0x1e   :  { %vm62_vm0 = vcmp.eq.f32.partialorder %v60_v26, 0.6666667  ;;  %vm63_vm1 = vcmp.eq.f32.partialorder %v61_v27, 0.6666667  ;;  %69 = vst [vmem:[#allocation5 + $0x8] sm:$0xff] %v34_v28 }
  0x1f   :  { %v64_v32 = vsel %vm62_vm0, 0.4, %v60_v26  ;;  %v65_v33 = vsel %vm63_vm1, 0.4, %v61_v27  ;;  %70 = vst [vmem:[#allocation5 + $0x20] sm:$0xff] %v35_v29 }
  0x20   :  { %vm47_vm2 = vcmp.eq.f32.partialorder %v45_v30, 0.2857143  ;;  %66 = vst [vmem:[#allocation5] sm:$0xff] %v64_v32  ;;  %67 = vst [vmem:[#allocation5 + $0x18] sm:$0xff] %v65_v33  ;;  %vm48_vm3 = vcmp.eq.f32.partialorder %v46_v31, 0.2857143 }
  0x21   :  { %v49_v34 = vsel %vm47_vm2, 0.4, %v45_v30  ;;  %v50_v35 = vsel %vm48_vm3, 0.4, %v46_v31 }
  0x22   :  { %72 = vst [vmem:[#allocation5 + $0x10] sm:$0xff] %v49_v34  ;;  %73 = vst [vmem:[#allocation5 + $0x28] sm:$0xff] %v50_v35 }
  0x23   :  { %128 = shalt.err (!%p125_p12)
}
  0x24   :  { %s129_s24 = scalar_lea.hbm %s188_s1, 768 }
  0x25   :  { %p130_p13 = scmp.ne.s32.totalorder %s188_s1, %s129_s24  ;;  %p133_p0 = scmp.lt.u32.totalorder %s129_s24, %s188_s1 }
  0x27   :  { %p135_p1 = pnand %p133_p0, %p130_p13 }
  0x29   :  { %138 = shalt.err (!%p135_p1)
}
  0x2a   :  { %85 = dma.vmem_to_hbm [thread:$0]  %s80_s20, 768, %s188_s1, [#allocation4], %s144_s16, %s144_s16, %s145_s17  }
  0x2b   :  { %141 = dma.done.wait [#allocation4], 768  }
  0x2c   :  { %142 = vsyncadd [#allocation4], 4294966528 }
  0x2d   :  { %89 = vsyncpa [#allocation3], 1 }
  0x2e   :  { %90 = vsyncpa [#allocation4], 1 }

</bundles_post_ra>
